<compile_context>
chip_gen: v6e
topology: v6e:2x2x1
jax: 0.10.0
libtpu: 0.0.40
codegen_flags: <defaults>
</compile_context>

<pallas_src>
import math
import functools

import jax
import jax.numpy as jnp
from jax import lax
from jax.experimental import pallas as pl
from jax.experimental.pallas import tpu as pltpu


# ----------------------------- ALiBi slopes (host-side, tiny) ----------------

def get_alibi_slopes(num_heads):
    def get_slopes_power_of_2(n):
        start = 2 ** (-2 ** (-(math.log2(n) - 3)))
        ratio = start
        return [start * ratio ** i for i in range(n)]

    if math.log2(num_heads).is_integer():
        return get_slopes_power_of_2(num_heads)
    closest = 2 ** math.floor(math.log2(num_heads))
    return (get_slopes_power_of_2(closest)
            + get_slopes_power_of_2(2 * closest)[0:num_heads - closest])


def make_alibi_bias(num_heads, seq_len):
    # Reference-path only: the Pallas kernels never materialize this tensor.
    pos = jnp.arange(seq_len)
    rel = jnp.abs(pos[None, :] - pos[:, None]).astype(jnp.float32)
    slopes = jnp.asarray(get_alibi_slopes(num_heads), jnp.float32)
    return -slopes[:, None, None] * rel[None, :, :]


# ----------------------------- small helpers ---------------------------------

def _layer_norm(x, gamma, beta, eps=1e-5):
    mu = jnp.mean(x, axis=-1, keepdims=True)
    var = jnp.mean((x - mu) ** 2, axis=-1, keepdims=True)
    return (x - mu) * lax.rsqrt(var + eps) * gamma[None, :] + beta[None, :]


def _gelu_exact(x):
    # matches torch.nn.GELU() (erf-based, exact)
    return 0.5 * x * (1.0 + lax.erf(x * (1.0 / math.sqrt(2.0))))


def _pick_block(n, cap):
    """Largest divisor of n that is <= cap."""
    b = max(1, min(n, cap))
    while n % b:
        b -= 1
    return b


def _vmem_limit(block_bytes):
    # Explicit scoped-VMEM budget derived from the chosen tiles
    # (double-buffered blocks + headroom), clamped so it is valid on every
    # generation (v7x physical VMEM is 64 MiB).
    est = 2 * int(block_bytes) + (8 << 20)
    return int(min(max(est, 32 << 20), 64 << 20))


def _cost(flops, transcendentals, bytes_accessed):
    return pl.CostEstimate(flops=int(flops),
                           transcendentals=int(transcendentals),
                           bytes_accessed=int(bytes_accessed))


# ----------------------------- kernel 1: LN1 + QKV projection ----------------

def ln_qkv_kernel(x_ref, w_ref, b_ref, g_ref, be_ref, qkv_ref, *, hidden, q_scale):
    x = x_ref[0]                                             # (ts, H) f32
    xn = _layer_norm(x, g_ref[0], be_ref[0])
    out = jnp.dot(xn.astype(w_ref.dtype), w_ref[...],
                  preferred_element_type=jnp.float32) + b_ref[0][None, :]
    # Fold the 1/sqrt(D) attention scale into the q columns (cols [0, H)) so
    # the attention kernel never scales an O(S^2) tensor.
    col = lax.broadcasted_iota(jnp.int32, out.shape, 1)
    out = jnp.where(col < hidden, out * q_scale, out)
    qkv_ref[0] = out.astype(qkv_ref.dtype)


def _ln_qkv(x, w_qkv, b_qkv, g1, be1, *, q_scale, block_s, compute_dtype):
    B, S, H = x.shape
    H3 = w_qkv.shape[1]
    w_bytes = w_qkv.dtype.itemsize
    block_bytes = (block_s * H * 4 + H * H3 * w_bytes + H3 * 4 + 2 * H * 4
                   + block_s * H3 * w_bytes)

    kernel = functools.partial(ln_qkv_kernel, hidden=H, q_scale=q_scale)
    return pl.pallas_call(
        kernel,
        out_shape=jax.ShapeDtypeStruct((B, S, H3), compute_dtype),
        grid_spec=pltpu.PrefetchScalarGridSpec(
            num_scalar_prefetch=0,
            grid=(B, S // block_s),
            in_specs=[
                pl.BlockSpec((1, block_s, H), lambda b, s: (b, s, 0)),  # x
                pl.BlockSpec((H, H3), lambda b, s: (0, 0)),             # W_qkv
                pl.BlockSpec((1, H3), lambda b, s: (0, 0)),             # b_qkv
                pl.BlockSpec((1, H), lambda b, s: (0, 0)),              # gamma1
                pl.BlockSpec((1, H), lambda b, s: (0, 0)),              # beta1
            ],
            out_specs=pl.BlockSpec((1, block_s, H3), lambda b, s: (b, s, 0)),
        ),
        compiler_params=pltpu.CompilerParams(
            dimension_semantics=("parallel", "parallel"),
            vmem_limit_bytes=_vmem_limit(block_bytes)),
        cost_estimate=_cost(
            flops=2 * B * S * H * H3 + 10 * B * S * H,
            transcendentals=B * S,
            bytes_accessed=B * S * H * 4 + H * H3 * w_bytes + B * S * H3 * w_bytes),
    )(x, w_qkv, b_qkv, g1, be1)


# ------------ kernel 2: flash attention + in-kernel ALiBi + fused out-proj ---

def flash_alibi_outproj_kernel(slopes_ref, q_ref, k_ref, v_ref, wout_ref,
                               bout_ref, x_ref, o_ref,
                               m_scr, l_scr, acc_scr, *, block_q, block_kv):
    qi = pl.program_id(1)
    h = pl.program_id(2)
    ki = pl.program_id(3)

    @pl.when(jnp.logical_and(h == 0, ki == 0))
    def _init_out():
        # residual + out-projection bias, computed once per (b, q-tile).
        o_ref[0] = x_ref[0] + bout_ref[0][None, :]

    @pl.when(ki == 0)
    def _init_head():
        m_scr[...] = jnp.full(m_scr.shape, -jnp.inf, m_scr.dtype)
        l_scr[...] = jnp.zeros(l_scr.shape, l_scr.dtype)
        acc_scr[...] = jnp.zeros(acc_scr.shape, acc_scr.dtype)

    q = q_ref[0, 0]                                          # (tq, D), pre-scaled
    k = k_ref[0, 0]                                          # (tkv, D)
    v = v_ref[0, 0]                                          # (tkv, D)

    # q @ k^T with contraction on the last dims (no materialized transpose).
    s = lax.dot_general(q, k, (((1,), (1,)), ((), ())),
                        preferred_element_type=jnp.float32)  # (tq, tkv) f32

    # ALiBi bias generated in-kernel: -slope * |i - j|  (cheap VPU filler).
    rows = qi * block_q + lax.broadcasted_iota(jnp.int32, s.shape, 0)
    cols = ki * block_kv + lax.broadcasted_iota(jnp.int32, s.shape, 1)
    s = s - slopes_ref[h] * jnp.abs(rows - cols).astype(jnp.float32)

    # online softmax update
    m_prev = m_scr[...]
    m_new = jnp.maximum(m_prev, jnp.max(s, axis=-1, keepdims=True))
    alpha = jnp.exp(m_prev - m_new)
    p = jnp.exp(s - m_new)
    l_scr[...] = alpha * l_scr[...] + jnp.sum(p, axis=-1, keepdims=True)
    acc_scr[...] = alpha * acc_scr[...] + jnp.dot(
        p.astype(v.dtype), v, preferred_element_type=jnp.float32)
    m_scr[...] = m_new

    @pl.when(ki == pl.num_programs(3) - 1)
    def _finalize_head():
        inv_l = pl.reciprocal(l_scr[...], approx=True)       # EUP, frees VALU
        ctx_h = acc_scr[...] * inv_l                         # (tq, D) f32
        # Fused per-head out-projection slab, accumulated straight into the
        # resident (tq, H) output tile: no (B,NH,S,D) ctx tensor in HBM.
        o_ref[0] = o_ref[0] + jnp.dot(ctx_h.astype(wout_ref.dtype), wout_ref[...],
                                      preferred_element_type=jnp.float32)


def _flash_alibi_outproj(q, k, v, slopes, w_out, b_out, x,
                         *, block_q, block_kv):
    B, NH, S, D = q.shape
    H = NH * D
    c_bytes = q.dtype.itemsize
    w_bytes = w_out.dtype.itemsize
    block_bytes = (2 * block_q * D * c_bytes + 4 * block_kv * D * c_bytes
                   + D * H * w_bytes + H * 4
                   + 2 * block_q * H * 4                      # x tile + out tile
                   + block_q * (D + 2) * 4)                   # scratch

    kernel = functools.partial(flash_alibi_outproj_kernel,
                               block_q=block_q, block_kv=block_kv)
    return pl.pallas_call(
        kernel,
        out_shape=jax.ShapeDtypeStruct((B, S, H), jnp.float32),
        grid_spec=pltpu.PrefetchScalarGridSpec(
            num_scalar_prefetch=1,                            # slopes -> SMEM
            grid=(B, S // block_q, NH, S // block_kv),
            in_specs=[
                pl.BlockSpec((1, 1, block_q, D),
                             lambda b, i, h, j, s_ref: (b, h, i, 0)),   # q
                pl.BlockSpec((1, 1, block_kv, D),
                             lambda b, i, h, j, s_ref: (b, h, j, 0)),   # k
                pl.BlockSpec((1, 1, block_kv, D),
                             lambda b, i, h, j, s_ref: (b, h, j, 0)),   # v
                pl.BlockSpec((D, H),
                             lambda b, i, h, j, s_ref: (h, 0)),         # W_out slab
                pl.BlockSpec((1, H),
                             lambda b, i, h, j, s_ref: (0, 0)),         # b_out
                pl.BlockSpec((1, block_q, H),
                             lambda b, i, h, j, s_ref: (b, i, 0)),      # residual x
            ],
            out_specs=pl.BlockSpec((1, block_q, H),
                                   lambda b, i, h, j, s_ref: (b, i, 0)),
            scratch_shapes=[
                pltpu.VMEM((block_q, 1), jnp.float32),        # running max  m
                pltpu.VMEM((block_q, 1), jnp.float32),        # running sum  l
                pltpu.VMEM((block_q, D), jnp.float32),        # per-head accum
            ]),
        compiler_params=pltpu.CompilerParams(
            # head + kv axes accumulate into the resident output tile.
            dimension_semantics=("parallel", "parallel", "arbitrary", "arbitrary"),
            vmem_limit_bytes=_vmem_limit(block_bytes)),
        cost_estimate=_cost(
            flops=4 * B * NH * S * S * D + 2 * B * S * H * H + 8 * B * NH * S * S,
            transcendentals=B * NH * S * S + B * NH * S,
            bytes_accessed=(3 * B * S * H * c_bytes + 2 * B * S * H * 4
                            + H * H * w_bytes + NH * 4)),
    )(slopes, q, k, v, w_out, b_out, x)


# ----------------------------- kernel 3: LN2 + FFN (F streamed) --------------

def ln2_ffn_kernel(x1_ref, g2_ref, be2_ref,
                   wff1_ref, bff1_ref, wff2_ref, bff2_ref, o_ref,
                   x2n_scr, acc_scr):
    f = pl.program_id(2)

    @pl.when(f == 0)
    def _init():
        x2n_scr[...] = _layer_norm(x1_ref[0], g2_ref[0], be2_ref[0]).astype(x2n_scr.dtype)
        acc_scr[...] = jnp.zeros(acc_scr.shape, acc_scr.dtype)

    # Stream one (H, tf) slab of W_ffn1 and one (tf, H) slab of W_ffn2 per step.
    hbl = jnp.dot(x2n_scr[...], wff1_ref[...],
                  preferred_element_type=jnp.float32) + bff1_ref[0][None, :]
    hbl = _gelu_exact(hbl)
    acc_scr[...] += jnp.dot(hbl.astype(wff2_ref.dtype), wff2_ref[...],
                            preferred_element_type=jnp.float32)

    @pl.when(f == pl.num_programs(2) - 1)
    def _finalize():
        o_ref[0] = (x1_ref[0] + acc_scr[...] + bff2_ref[0][None, :]).astype(o_ref.dtype)


def _ln2_ffn(x1, g2, be2, w_ff1, b_ff1, w_ff2, b_ff2,
             *, block_s, block_f, compute_dtype):
    B, S, H = x1.shape
    F = w_ff1.shape[1]
    w_bytes = w_ff1.dtype.itemsize
    block_bytes = (2 * block_s * H * 4                                # x1 + out tiles
                   + 2 * H * block_f * w_bytes                        # weight slabs
                   + (block_f + 3 * H) * 4                            # biases / norm
                   + block_s * H * (4 + w_bytes)                      # scratch
                   + block_s * block_f * 4)

    return pl.pallas_call(
        ln2_ffn_kernel,
        out_shape=jax.ShapeDtypeStruct((B, S, H), jnp.float32),
        grid_spec=pltpu.PrefetchScalarGridSpec(
            num_scalar_prefetch=0,
            grid=(B, S // block_s, F // block_f),
            in_specs=[
                pl.BlockSpec((1, block_s, H), lambda b, s, f: (b, s, 0)),  # x1
                pl.BlockSpec((1, H), lambda b, s, f: (0, 0)),              # gamma2
                pl.BlockSpec((1, H), lambda b, s, f: (0, 0)),              # beta2
                pl.BlockSpec((H, block_f), lambda b, s, f: (0, f)),        # W_ffn1 slab
                pl.BlockSpec((1, block_f), lambda b, s, f: (0, f)),        # b_ffn1 slab
                pl.BlockSpec((block_f, H), lambda b, s, f: (f, 0)),        # W_ffn2 slab
                pl.BlockSpec((1, H), lambda b, s, f: (0, 0)),              # b_ffn2
            ],
            out_specs=pl.BlockSpec((1, block_s, H), lambda b, s, f: (b, s, 0)),
            scratch_shapes=[
                pltpu.VMEM((block_s, H), compute_dtype),      # LayerNorm2 output
                pltpu.VMEM((block_s, H), jnp.float32),        # FFN accumulator
            ]),
        compiler_params=pltpu.CompilerParams(
            dimension_semantics=("parallel", "parallel", "arbitrary"),
            vmem_limit_bytes=_vmem_limit(block_bytes)),
        cost_estimate=_cost(
            flops=4 * B * S * H * F + 12 * B * S * H,
            transcendentals=B * S * F + B * S,
            bytes_accessed=(2 * B * S * H * 4 + 2 * H * F * w_bytes
                            + F * 4 + 3 * H * 4)),
    )(x1, g2, be2, w_ff1, b_ff1, w_ff2, b_ff2)


# ----------------------------- top-level wrapper ------------------------------

def transformer_layer(x, params, num_heads, *, compute_dtype=jnp.float32,
                      block_q=128, block_kv=128, block_s=128, block_f=512):
    """TransformerLayer forward (inference).  compute_dtype=jnp.bfloat16 runs
    all GEMMs with bf16 inputs / f32 accumulation (recommended on v6e/v7x);
    LayerNorm, softmax and residuals stay f32."""
    B, S, H = x.shape
    NH = num_heads
    D = H // NH
    F = params['w_ffn1'].shape[1]

    block_q = _pick_block(S, block_q)
    block_kv = _pick_block(S, block_kv)
    block_s = _pick_block(S, block_s)
    block_f = _pick_block(F, block_f)

    x = x.astype(jnp.float32)
    cast_w = lambda w: w.astype(compute_dtype)
    slopes = jnp.asarray(get_alibi_slopes(NH), jnp.float32)

    # 1) LayerNorm1 + QKV projection (attention scale folded into q columns).
    qkv = _ln_qkv(x, cast_w(params['w_qkv']), params['b_qkv'],
                  params['g1'], params['be1'],
                  q_scale=D ** -0.5, block_s=block_s, compute_dtype=compute_dtype)

    # Head split: pure layout, handled by XLA outside the kernels
    # (O(B*S*H) bytes, tiny compared with the removed O(NH*S^2) tensors).
    qkv = qkv.reshape(B, S, 3, NH, D)
    q = jnp.transpose(qkv[:, :, 0], (0, 2, 1, 3))            # (B, NH, S, D)
    k = jnp.transpose(qkv[:, :, 1], (0, 2, 1, 3))
    v = jnp.transpose(qkv[:, :, 2], (0, 2, 1, 3))

    # 2) Flash attention with in-kernel ALiBi, fused per-head out-projection
    #    and fused residual add -> x1 = x + attn_out directly in (B, S, H).
    x1 = _flash_alibi_outproj(q, k, v, slopes,
                              cast_w(params['w_out']), params['b_out'], x,
                              block_q=block_q, block_kv=block_kv)

    # 3) LayerNorm2 + FFN (F streamed in slabs) + residual.
    return _ln2_ffn(x1, params['g2'], params['be2'],
                    cast_w(params['w_ffn1']), params['b_ffn1'],
                    cast_w(params['w_ffn2']), params['b_ffn2'],
                    block_s=block_s, block_f=block_f,
                    compute_dtype=compute_dtype)


# ----------------------------- pure-JAX reference -----------------------------

def reference_forward(x, params, num_heads):
    B, S, H = x.shape
    NH = num_heads
    D = H // NH
    alibi = make_alibi_bias(NH, S)

    def ln(v, g, b, eps=1e-5):
        mu = v.mean(-1, keepdims=True)
        var = ((v - mu) ** 2).mean(-1, keepdims=True)
        return (v - mu) / jnp.sqrt(var + eps) * g + b

    residual = x
    xn = ln(x, params['g1'][0], params['be1'][0])
    qkv = xn @ params['w_qkv'] + params['b_qkv'][0]
    q, k, v = jnp.split(qkv, 3, axis=-1)
    heads = lambda t: t.reshape(B, S, NH, D).transpose(0, 2, 1, 3)
    q, k, v = heads(q), heads(k), heads(v)
    sc = jnp.einsum('bhqd,bhkd->bhqk', q, k) * (D ** -0.5) + alibi[None]
    w = jax.nn.softmax(sc, axis=-1)
    ctx = jnp.einsum('bhqk,bhkd->bhqd', w, v).transpose(0, 2, 1, 3).reshape(B, S, H)
    attn_out = ctx @ params['w_out'] + params['b_out'][0]
    x1 = residual + attn_out
    x2n = ln(x1, params['g2'][0], params['be2'][0])
    h = x2n @ params['w_ffn1'] + params['b_ffn1'][0]
    h = 0.5 * h * (1.0 + lax.erf(h / math.sqrt(2.0)))
    return x1 + h @ params['w_ffn2'] + params['b_ffn2'][0]


# ----------------------------- main -------------------------------------------

if __name__ == "__main__":
    # Small but lane-friendly shapes: H and F are multiples of 128, S of 8.
    B, S, H, NH = 2, 16, 128, 4
    F = H * 4

    key = jax.random.PRNGKey(0)
    keys = jax.random.split(key, 13)

    def init(k, shape, scl=0.05):
        return jax.random.normal(k, shape, jnp.float32) * scl

    params = {
        'w_qkv':  init(keys[0], (H, 3 * H)),
        'b_qkv':  init(keys[1], (1, 3 * H)),
        'w_out':  init(keys[2], (H, H)),
        'b_out':  init(keys[3], (1, H)),
        'g1':     jnp.ones((1, H), jnp.float32) + init(keys[4], (1, H), 0.01),
        'be1':    init(keys[5], (1, H), 0.01),
        'g2':     jnp.ones((1, H), jnp.float32) + init(keys[6], (1, H), 0.01),
        'be2':    init(keys[7], (1, H), 0.01),
        'w_ffn1': init(keys[8], (H, F)),
        'b_ffn1': init(keys[9], (1, F)),
        'w_ffn2': init(keys[10], (F, H)),
        'b_ffn2': init(keys[11], (1, H)),
    }
    x = jax.random.normal(keys[12], (B, S, H), jnp.float32)

    # Small blocks so the grid actually exercises the q/kv/head and F-slab tiling.
    out = transformer_layer(x, params, NH, compute_dtype=jnp.float32,
                            block_q=8, block_kv=8, block_s=8, block_f=256)
    out = jax.block_until_ready(out)

    ref = reference_forward(x, params, NH)
    assert out.shape == (B, S, H)
    err = float(jnp.max(jnp.abs(out - ref)))
    # approx reciprocal (EUP) + online-softmax reassociation => looser than
    # exact-f32 tolerance.
    assert err < 1e-2, f"f32 max err {err}"

    # bf16 GEMM inputs / f32 accumulation (the v6e/v7x-recommended mode).
    out_bf16 = transformer_layer(x, params, NH, compute_dtype=jnp.bfloat16,
                                 block_q=8, block_kv=8, block_s=8, block_f=256)
    out_bf16 = jax.block_until_ready(out_bf16)
    err_bf16 = float(jnp.max(jnp.abs(out_bf16.astype(jnp.float32) - ref)))
    assert err_bf16 < 0.1, f"bf16 max err {err_bf16}"

    print("KERNEL_OK")
</pallas_src>

<mosaic_0001>
module attributes {stable_mosaic.version = 11 : i64} {
  func.func @ln_qkv_kernel(%arg0: i32, %arg1: i32, %arg2: memref<1x8x128xf32, #tpu.memory_space<vmem>>, %arg3: memref<128x384xf32, #tpu.memory_space<vmem>>, %arg4: memref<1x384xf32, #tpu.memory_space<vmem>>, %arg5: memref<1x128xf32, #tpu.memory_space<vmem>>, %arg6: memref<1x128xf32, #tpu.memory_space<vmem>>, %arg7: memref<1x8x384xf32, #tpu.memory_space<vmem>>) attributes {dimension_semantics = [#tpu.dimension_semantics<parallel>, #tpu.dimension_semantics<parallel>], iteration_bounds = array<i64: 2, 2>, scalar_prefetch = 0 : i64, scratch_operands = 0 : i64, tpu.core_type = #tpu.core_type<tc>, window_params = [{transform_indices = @transform_0, window_bounds = array<i64: 1, 8, 128>}, {pipeline_mode = #tpu.pipeline_mode<synchronous>, transform_indices = @transform_1, window_bounds = array<i64: 128, 384>}, {pipeline_mode = #tpu.pipeline_mode<synchronous>, transform_indices = @transform_2, window_bounds = array<i64: 1, 384>}, {pipeline_mode = #tpu.pipeline_mode<synchronous>, transform_indices = @transform_3, window_bounds = array<i64: 1, 128>}, {pipeline_mode = #tpu.pipeline_mode<synchronous>, transform_indices = @transform_4, window_bounds = array<i64: 1, 128>}, {transform_indices = @transform_5, window_bounds = array<i64: 1, 8, 384>}]} {
    %c0 = arith.constant 0 : index
    %c0_0 = arith.constant 0 : index
    %c0_1 = arith.constant 0 : index
    %0 = vector.load %arg2[%c0, %c0_0, %c0_1] : memref<1x8x128xf32, #tpu.memory_space<vmem>>, vector<1x8x128xf32>
    %1 = vector.shape_cast %0 : vector<1x8x128xf32> to vector<8x128xf32>
    %c0_2 = arith.constant 0 : index
    %c0_3 = arith.constant 0 : index
    %2 = vector.load %arg5[%c0_2, %c0_3] : memref<1x128xf32, #tpu.memory_space<vmem>>, vector<1x128xf32>
    %3 = vector.shape_cast %2 : vector<1x128xf32> to vector<128xf32>
    %c0_4 = arith.constant 0 : index
    %c0_5 = arith.constant 0 : index
    %4 = vector.load %arg6[%c0_4, %c0_5] : memref<1x128xf32, #tpu.memory_space<vmem>>, vector<1x128xf32>
    %5 = vector.shape_cast %4 : vector<1x128xf32> to vector<128xf32>
    %cst = arith.constant dense<0.000000e+00> : vector<8xf32>
    %6 = vector.multi_reduction <add>, %1, %cst [1] : vector<8x128xf32> to vector<8xf32>
    %7 = vector.shape_cast %6 : vector<8xf32> to vector<8x1xf32>
    %cst_6 = arith.constant 1.280000e+02 : f32
    %8 = vector.broadcast %cst_6 : f32 to vector<8x1xf32>
    %9 = arith.divf %7, %8 : vector<8x1xf32>
    %10 = vector.broadcast %9 : vector<8x1xf32> to vector<8x128xf32>
    %11 = arith.subf %1, %10 : vector<8x128xf32>
    %12 = arith.mulf %11, %11 : vector<8x128xf32>
    %cst_7 = arith.constant dense<0.000000e+00> : vector<8xf32>
    %13 = vector.multi_reduction <add>, %12, %cst_7 [1] : vector<8x128xf32> to vector<8xf32>
    %14 = vector.shape_cast %13 : vector<8xf32> to vector<8x1xf32>
    %cst_8 = arith.constant 1.280000e+02 : f32
    %15 = vector.broadcast %cst_8 : f32 to vector<8x1xf32>
    %16 = arith.divf %14, %15 : vector<8x1xf32>
    %17 = vector.broadcast %9 : vector<8x1xf32> to vector<8x128xf32>
    %18 = arith.subf %1, %17 : vector<8x128xf32>
    %cst_9 = arith.constant 9.99999974E-6 : f32
    %19 = vector.broadcast %cst_9 : f32 to vector<8x1xf32>
    %20 = arith.addf %16, %19 : vector<8x1xf32>
    %21 = math.rsqrt %20 : vector<8x1xf32>
    %22 = vector.broadcast %21 : vector<8x1xf32> to vector<8x128xf32>
    %23 = arith.mulf %18, %22 : vector<8x128xf32>
    %24 = vector.shape_cast %3 : vector<128xf32> to vector<1x128xf32>
    %25 = vector.broadcast %24 : vector<1x128xf32> to vector<8x128xf32>
    %26 = arith.mulf %23, %25 : vector<8x128xf32>
    %27 = vector.shape_cast %5 : vector<128xf32> to vector<1x128xf32>
    %28 = vector.broadcast %27 : vector<1x128xf32> to vector<8x128xf32>
    %29 = arith.addf %26, %28 : vector<8x128xf32>
    %c0_10 = arith.constant 0 : index
    %c0_11 = arith.constant 0 : index
    %30 = vector.load %arg3[%c0_10, %c0_11] : memref<128x384xf32, #tpu.memory_space<vmem>>, vector<128x384xf32>
    %cst_12 = arith.constant dense<0.000000e+00> : vector<8x384xf32>
    %31 = tpu.matmul %29, %30, %cst_12 {dimension_numbers = #tpu.dot_dimension_numbers<[1], [0], [0], [1], [0, 0, 1, 1], [], []>} : vector<8x128xf32>, vector<128x384xf32>, vector<8x384xf32> -> vector<8x384xf32>
    %c0_13 = arith.constant 0 : index
    %c0_14 = arith.constant 0 : index
    %32 = vector.load %arg4[%c0_13, %c0_14] : memref<1x384xf32, #tpu.memory_space<vmem>>, vector<1x384xf32>
    %33 = vector.shape_cast %32 : vector<1x384xf32> to vector<384xf32>
    %34 = vector.shape_cast %33 : vector<384xf32> to vector<1x384xf32>
    %35 = vector.broadcast %34 : vector<1x384xf32> to vector<8x384xf32>
    %36 = arith.addf %31, %35 : vector<8x384xf32>
    %37 = tpu.iota {dimensions = array<i32: 1>} : vector<8x384xi32>
    %c128_i32 = arith.constant 128 : i32
    %38 = vector.broadcast %c128_i32 : i32 to vector<8x384xi32>
    %39 = arith.cmpi slt, %37, %38 : vector<8x384xi32>
    %cst_15 = arith.constant 0.176776692 : f32
    %40 = vector.broadcast %cst_15 : f32 to vector<8x384xf32>
    %41 = arith.mulf %36, %40 : vector<8x384xf32>
    %42 = arith.select %39, %41, %36 : vector<8x384xi1>, vector<8x384xf32>
    %c0_16 = arith.constant 0 : index
    %c0_17 = arith.constant 0 : index
    %c0_18 = arith.constant 0 : index
    %43 = vector.load %arg7[%c0_16, %c0_17, %c0_18] : memref<1x8x384xf32, #tpu.memory_space<vmem>>, vector<1x8x384xf32>
    %44 = vector.shape_cast %43 : vector<1x8x384xf32> to vector<8x384xf32>
    %45 = vector.shape_cast %42 : vector<8x384xf32> to vector<1x8x384xf32>
    tpu.vector_store %arg7[%c0_16, %c0_17, %c0_18], %45 {strides = array<i32>} : memref<1x8x384xf32, #tpu.memory_space<vmem>>, vector<1x8x384xf32>,
    return
  }
  func.func @transform_0(%arg0: i32, %arg1: i32) -> (i32, i32, i32) {
    %c0_i32 = arith.constant 0 : i32
    %c0_i32_0 = arith.constant 0 : i32
    return %arg0, %arg1, %c0_i32 : i32, i32, i32
  }
  func.func @transform_1(%arg0: i32, %arg1: i32) -> (i32, i32) {
    %c0_i32 = arith.constant 0 : i32
    %c0_i32_0 = arith.constant 0 : i32
    %c0_i32_1 = arith.constant 0 : i32
    return %c0_i32, %c0_i32_0 : i32, i32
  }
  func.func @transform_2(%arg0: i32, %arg1: i32) -> (i32, i32) {
    %c0_i32 = arith.constant 0 : i32
    %c0_i32_0 = arith.constant 0 : i32
    %c0_i32_1 = arith.constant 0 : i32
    return %c0_i32, %c0_i32_0 : i32, i32
  }
  func.func @transform_3(%arg0: i32, %arg1: i32) -> (i32, i32) {
    %c0_i32 = arith.constant 0 : i32
    %c0_i32_0 = arith.constant 0 : i32
    %c0_i32_1 = arith.constant 0 : i32
    return %c0_i32, %c0_i32_0 : i32, i32
  }
  func.func @transform_4(%arg0: i32, %arg1: i32) -> (i32, i32) {
    %c0_i32 = arith.constant 0 : i32
    %c0_i32_0 = arith.constant 0 : i32
    %c0_i32_1 = arith.constant 0 : i32
    return %c0_i32, %c0_i32_0 : i32, i32
  }
  func.func @transform_5(%arg0: i32, %arg1: i32) -> (i32, i32, i32) {
    %c0_i32 = arith.constant 0 : i32
    %c0_i32_0 = arith.constant 0 : i32
    return %arg0, %arg1, %c0_i32 : i32, i32, i32
  }
}

</mosaic_0001>

<bundles_post_ra>
// kernel: tpu_custom_call.1
= control target key start
LH: loop header
LB: loop body
LE: loop exit
PB: predicated region body
PF: predicated region fallthrough
CT: control target
= control target key end

     0   :  { %s1218_s0 = inlined_call_operand.hbm [shape: f32[2,16,128], index: 0, kind: input, shape index: {}]   ;;  %s1219_s1 = inlined_call_operand.hbm [shape: f32[128,384], index: 1, kind: input, shape index: {}]   ;;  %s1220_s2 = inlined_call_operand.vmem [shape: f32[1,384], index: 2, kind: input, shape index: {}]   ;;  %s1221_s3 = inlined_call_operand.vmem [shape: f32[1,128], index: 3, kind: input, shape index: {}]   ;;  %s1222_s4 = inlined_call_operand.vmem [shape: f32[1,128], index: 4, kind: input, shape index: {}]   ;;  %s1223_s5 = inlined_call_operand.hbm [shape: f32[2,16,384], index: 5, kind: output, shape index: {}]  }
   0x1   :  { %1231 = sst [smem:[#allocation15_spill]] %s1219_s1 }
   0x2   :  { %1232 = sst [smem:[#allocation16_spill]] %s1220_s2 }
   0x3   :  { %1233 = sst [smem:[#allocation17_spill]] %s1223_s5 }
   0x4   :  { %10 = vsyncpa [#allocation3], 0 }
   0x5   :  { %12 = vsyncpa [#allocation3 + $0x1], 0 }
   0x6   :  { %13 = vsyncpa [#allocation6], 0 }
   0x7   :  { %14 = vsyncpa [#allocation4], 0 }
   0x8   :  { %16 = vsyncpa [#allocation4 + $0x1], 0  ;;  %s996_s18 = smov 0   ;;  %s998_s19 = smov 0  }
   0x9   :  { %s1000_s20 = smov 0   ;;  %s1002_s21 = smov 0  }
   0xa   :  { %s1004_s22 = smov 0   ;;  %s1006_s23 = smov 0  }
   0xb   :  { %s1008_s24 = smov 0   ;;  %s1010_s25 = smov 0  }
   0xc LB: > { %1234 = sst [smem:[#allocation11_spill]] %s929_s18  ;;  %s637_s26 = sadd.s32 4294967295, %s957_s25   ;;  %s957_s25 = sphi %s1010_s25, %s22_s25   ;;  %s953_s24 = sphi %s1008_s24, %s1262_s24   ;;  %s949_s23 = sphi %s1006_s23, %s1261_s23   ;;  %s945_s22 = sphi %s1004_s22, %s1260_s22   ;;  %s941_s21 = sphi %s1002_s21, %s1259_s21   ;;  %s937_s20 = sphi %s1000_s20, %s1258_s20   ;;  %s933_s19 = sphi %s998_s19, %s1257_s19   ;;  %s929_s18 = sphi %s996_s18, %s1256_s18  }
   0xd   : > { %s638_s27 = sadd.s32 4294967294, %s957_s25   ;;  %p56_p0 = scmp.ne.s32.totalorder %s933_s19, %s929_s18 }
   0xe   : > { %p1040_p1 = scmp.eq.s32.totalorder %s637_s26, 0  ;;  %p1044_p2 = scmp.eq.s32.totalorder %s637_s26, 3 }
   0xf   : > { %p172_p3 = scmp.eq.s32.totalorder %s638_s27, 3  ;;  %p639_p5 = scmp.ge.s32.totalorder %s957_s25, 1 }
  0x10   : > { %p1050_p4 = por %p1040_p1, %p56_p0  ;;  %p179_p7 = scmp.lt.s32.totalorder %s957_s25, 5 }
  0x11   : > { %p1055_p6 = por %p172_p3, %p56_p0  ;;  %s959_s8 = smov [#allocation5]  }
  0x12   : > { %s1237_s30 = scalar_select %p1050_p4, 1, 0 }
  0x13   : > { %s1238_s6 = scalar_select %p1055_p6, 1, 0 }
  0x14   : > { %p1060_p8 = pnand %p639_p5, %p179_p7  ;;  %s191_s9 = sshll.u32 %s959_s8, 4  ;;  %s192_s9 = int_to_ptr.vmem [resolvable:$true] %s191_s9 }
  0x15   : > { %1239 = sst [smem:[#allocation12_spill]] %s1238_s6  ;;  %s814_s10 = scalar_lea.vmem %s192_s9, 6144 }
  0x16   : > { %p716_p9 = pneg %p1060_p8  ;;  %p815_p12 = scmp.ne.s32.totalorder %s192_s9, %s814_s10 }
  0x17   : > { %p822_p3 = scmp.lt.s32.totalorder %s192_s9, %s192_s9  ;;  %p823_p6 = scmp.lt.s32.totalorder %s814_s10, %s814_s10 }
  0x18   : > { %p717_p10 = pnand %p716_p9, %p1040_p1 }
  0x19   : > { %p824_p4 = por %p823_p6, %p822_p3 }
  0x1a   : > { %p805_p11 = pneg %p717_p10 }
  0x1c   : > { %p817_p13 = pnand %p815_p12, %p805_p11 }
  0x1e   : > { %p818_p0 = pneg %p817_p13 }
  0x20   : > { %p825_p5 = pnand %p824_p4, %p818_p0 }
  0x22   : > { %828 = shalt.err (!%p825_p5)
}
  0x23   : > { %s960_s11 = smov 384   ;;  %s961_s12 = smov 24  }
  0x24   : > { %s1241_s1 = sld [smem:[#allocation15_spill]]  ;;  %s31_s15 = sadd.s32 1, %s949_s23 }
  0x25   : > { %p32_p4 = scmp.ge.s32.totalorder %s31_s15, 2  ;;  %s34_s16 = sadd.s32 1, %s953_s24 }
  0x26   : > { %s43_s17 = sadd.s32 1, %s937_s20  ;;  %p50_p6 = scmp.ne.s32.totalorder %s937_s20, %s933_s19 }
  0x27   : > { %s1264_s15 = smov (%p32_p4, %s31_s15), 0  ;;  %s1266_s16 = smov (!%p32_p4, %s34_s16), %s953_s24 }
  0x28   : > { %1242 = sst [smem:[#allocation13_spill]] %s1264_s15  ;;  %s39_s26 = ssub.s32 %s949_s23, %s1264_s15 }
  0x29   : > { %p51_p7 = scmp.eq.s32.totalorder %s957_s25, 0  ;;  %p36_p9 = scmp.ge.s32.totalorder %s1266_s16, 2 }
  0x2a   : > { %719 = dma.hbm_to_vmem [thread:$0]  (!%p717_p10), %s1241_s1, 6144, %s192_s9, [#allocation6], %s960_s11, %s960_s11, %s961_s12  }
  0x2b   : > { %p1084_p11 = por %p1044_p2, %p50_p6  ;;  %p1088_p10 = por %p51_p7, %p50_p6 }
  0x2c   : > { %p729_p12 = scmp.lt.s32.totalorder %s957_s25, 4  ;;  %s1268_s16 = smov (%p36_p9, %s1266_s16), 0 }
  0x2d   : > { %s1243_s27 = scalar_select %p1084_p11, 1, 0 }
  0x2e   : > { %s214_s9 = sand.u32 1, %s937_s20   ;;  %s643_s10 = sshll.u32 %s953_s24, 1 }
  0x2f   : > { %1244 = sst [smem:[#allocation14_spill]] %s1243_s27  ;;  %s38_s11 = ssub.s32 %s953_s24, %s1268_s16 }
  0x30   : > { %s40_s12 = sor.u32 %s39_s26, %s38_s11  ;;  %s642_s13 = sshll.u32 %s214_s9, 3 }
  0x31   : > { %p41_p13 = scmp.eq.s32.totalorder %s40_s12, 0  ;;  %s223_s29 = sadd.s32 %s949_s23, %s643_s10 }
  0x32   : > { %s218_s14 = scalar_lea.vmem [#allocation2], %s642_s13  ;;  %s644_s6 = sshll.u32 %s223_s29, 7 }
  0x33   : > { %s227_s1 = sshll.u32 %s218_s14, 4  ;;  %s225_s27 = scalar_lea.hbm %s1218_s0, %s644_s6  ;;  %s228_s1 = int_to_ptr.vmem [resolvable:$true] %s227_s1 }
  0x34   : > { %s1101_s15 = scalar_select %p41_p13, %s937_s20, %s43_s17  }
  0x35   : > { %p1110_p2 = pnand %p729_p12, %p1088_p10  ;;  %s215_s26 = scalar_lea.sflag [#allocation3], %s214_s9 }
  0x36   : > { %s842_s10 = scalar_lea.vmem %s228_s1, 128  ;;  %s962_s17 = smov [#allocation2]  }
  0x37   : > { %p831_p0 = pneg %p1110_p2  ;;  %p843_p3 = scmp.ne.s32.totalorder %s228_s1, %s842_s10 }
  0x38   : > { %s847_s11 = sshll.u32 %s962_s17, 4  ;;  %s848_s11 = int_to_ptr.vmem [resolvable:$false] %s847_s11 }
  0x39   : > { %p845_p5 = pnand %p843_p3, %p831_p0  ;;  %s849_s12 = scalar_lea.vmem %s848_s11, 256 }
  0x3a   : > { %p850_p6 = scmp.lt.s32.totalorder %s228_s1, %s848_s11  ;;  %p851_p7 = scmp.lt.s32.totalorder %s849_s12, %s842_s10 }
  0x3b   : > { %p846_p4 = pneg %p845_p5 }
  0x3c   : > { %p852_p9 = por %p851_p7, %p850_p6 }
  0x3e   : > { %p853_p13 = pnand %p852_p9, %p846_p4 }
  0x40   : > { %856 = shalt.err (!%p853_p13)
}
  0x41   : > { %723 = dma.hbm_to_vmem [thread:$0]  (!%p1110_p2), %s225_s27, 128, %s228_s1, %s215_s26  }
  0x42   : > { %236 = sbr.rel (%p1060_p8) target bundleno = 591 (0x24f), region = 40  ;;  %s1121_s5 = sand.u32 (!%p1060_p8), 1, %s933_s19  }
  0x43   : > { %s646_s18 = sshll.u32 (!%p1060_p8), %s1121_s5, 3  ;;  %s239_s6 = scalar_lea.sflag (!%p1060_p8), [#allocation3], %s1121_s5 }
  0x44   : > { %s242_s8 = scalar_lea.vmem (!%p1060_p8), [#allocation2], %s646_s18  ;;  %p1247_p10 = scmp.ne.s32.totalorder (!%p1060_p8), %s1237_s30, 0 }
  0x47   : > { %916 = dma.done.wait (%p1247_p10), %s239_s6, 128  }
  0x48   : > { %918 = vsyncadd (%p1247_p10), %s239_s6, 4294967168 }
  0x49   : > { %920 = dma.done.wait (%p1040_p1), [#allocation6], 6144  }
  0x4a   : > { %922 = vsyncadd (%p1040_p1), [#allocation6], 4294961152  ;;  %v273_v0 = vld [vmem:[%s242_s8] sm:$0xff]  ;;  %v347_v2 = vld [vmem:[#allocation5 + $0x168] sm:$0xff]  ;;  %v963_v4 = vmov 0.0   ;;  %vm964_vm0 = vmmov 0   ;;  %v352_v63 = vlaneseq }
  0x4b   : > { %276 = vadd.xlane.f32.xlu0 %v273_v0  ;;  %v348_v1 = vld [vmem:[#allocation5 + $0x170] sm:$0xff]  ;;  %v349_v3 = vld [vmem:[#allocation5 + $0x178] sm:$0xff]  ;;  %670 = vmatprep.subr.mxu1 %v963_v4  ;;  %v346_v7 = vld [vmem:[#allocation5 + $0x160] sm:$0xff]  ;;  %s705_s7 = smul.u32 24, %s1121_s5  ;;  %s1248_s14 = sld [smem:[#allocation16_spill]] }
  0x4c   : > { %367 = vmatprep.subr.mxu0 %v348_v1  ;;  %v345_v5 = vld [vmem:[#allocation5 + $0x158] sm:$0xff]  ;;  %v344_v6 = vld [vmem:[#allocation5 + $0x150] sm:$0xff]  ;;  %671 = vmatpush3.msra.mxu1 %v349_v3  ;;  %v342_v8 = vld [vmem:[#allocation5 + $0x140] sm:$0xff]  ;;  %s706_s27 = smul.u32 3, %s941_s21  ;;  %s1250_s18 = sld [smem:[#allocation17_spill]] }
  0x4d   : > { %368 = vmatpush1.msra.mxu0 %v347_v2  ;;  %672 = vmatprep.subr.mxu1 %v963_v4  ;;  %v341_v9 = vld [vmem:[#allocation5 + $0x138] sm:$0xff]  ;;  %v343_v10 = vld [vmem:[#allocation5 + $0x148] sm:$0xff]  ;;  %v338_v12 = vld [vmem:[#allocation5 + $0x120] sm:$0xff]  ;;  %s707_s9 = smul.u32 6, %s945_s22  ;;  %s272_s17 = scalar_lea.vmem [#allocation7], %s705_s7 }
  0x4e   : > { %369 = vmatprep.subr.mxu0 %v345_v5  ;;  %673 = vmatpush3.msra.mxu1 %v346_v7  ;;  %v339_v11 = vld [vmem:[#allocation5 + $0x128] sm:$0xff]  ;;  %v340_v13 = vld [vmem:[#allocation5 + $0x130] sm:$0xff]  ;;  %v337_v20 = vld [vmem:[#allocation5 + $0x118] sm:$0xff]  ;;  %s541_s12 = sshll.u32 %s272_s17, 4  ;;  %s525_s1 = scalar_lea.sflag [#allocation4], %s1121_s5  ;;  %s542_s12 = int_to_ptr.vmem [resolvable:$true] %s541_s12 }
  0x4f   : > { %370 = vmatpush1.msra.mxu0 %v344_v6  ;;  %674 = vmatprep.subr.mxu1 %v963_v4  ;;  %v336_v18 = vld [vmem:[#allocation5 + $0x110] sm:$0xff]  ;;  %v335_v19 = vld [vmem:[#allocation5 + $0x108] sm:$0xff]  ;;  %v333_v21 = vld [vmem:[#allocation5 + $0xf8] sm:$0xff]  ;;  %s537_s26 = sadd.s32 %s707_s9, %s706_s27  ;;  %s857_s2 = scalar_lea.vmem %s542_s12, 384 }
  0x50   : > { %371 = vmatprep.subr.mxu0 %v342_v8  ;;  %675 = vmatpush3.msra.mxu1 %v343_v10  ;;  %v332_v22 = vld [vmem:[#allocation5 + $0xf0] sm:$0xff]  ;;  %v334_v23 = vld [vmem:[#allocation5 + $0x100] sm:$0xff]  ;;  %v329_v25 = vld [vmem:[#allocation5 + $0xd8] sm:$0xff]  ;;  %s650_s10 = sshll.u32 %s537_s26, 7  ;;  %p858_p1 = scmp.ne.s32.totalorder %s542_s12, %s857_s2 }
  0x51   : > { %372 = vmatpush1.msra.mxu0 %v341_v9  ;;  %676 = vmatprep.subr.mxu1 %v963_v4  ;;  %v330_v24 = vld [vmem:[#allocation5 + $0xe0] sm:$0xff]  ;;  %v331_v26 = vld [vmem:[#allocation5 + $0xe8] sm:$0xff]  ;;  %v328_v29 = vld [vmem:[#allocation5 + $0xd0] sm:$0xff]  ;;  %s965_s28 = smov [#allocation7]  }
  0x52   : > { %373 = vmatprep.subr.mxu0 %v339_v11  ;;  %677 = vmatpush3.msra.mxu1 %v340_v13  ;;  %v327_v27 = vld [vmem:[#allocation5 + $0xc8] sm:$0xff]  ;;  %v326_v28 = vld [vmem:[#allocation5 + $0xc0] sm:$0xff]  ;;  %v324_v30 = vld [vmem:[#allocation5 + $0xb0] sm:$0xff]  ;;  %s1251_s6 = smov %s1250_s18  ;;  %s1171_s8 = scalar_lea.hbm %s1250_s18, %s650_s10 }
  0x53   : > { %374 = vmatpush1.msra.mxu0 %v338_v12  ;;  %678 = vmatprep.subr.mxu1 %v963_v4  ;;  %v323_v31 = vld [vmem:[#allocation5 + $0xa8] sm:$0xff]  ;;  %v325_v32 = vld [vmem:[#allocation5 + $0xb8] sm:$0xff]  ;;  %v320_v34 = vld [vmem:[#allocation5 + $0x90] sm:$0xff]  ;;  %p859_p8 = pnand %p858_p1, %p1084_p11  ;;  %s861_s30 = sshll.u32 %s965_s28, 4  ;;  %s862_s30 = int_to_ptr.vmem [resolvable:$false] %s861_s30 }
  0x54   : > { %431 = vmatprep.mubr.f32.mxu0 %v963_v4  ;;  %375 = vmatprep.subr.mxu0 %v336_v18  ;;  %v321_v33 = vld [vmem:[#allocation5 + $0x98] sm:$0xff]  ;;  %v322_v35 = vld [vmem:[#allocation5 + $0xa0] sm:$0xff]  ;;  %v319_v38 = vld [vmem:[#allocation5 + $0x88] sm:$0xff]  ;;  %s863_s7 = scalar_lea.vmem %s862_s30, 768  ;;  %p864_p2 = scmp.lt.s32.totalorder %s542_s12, %s862_s30 }
  0x55   : > { %376 = vmatpush1.msra.mxu0 %v335_v19  ;;  %679 = vmatpush3.msra.mxu1 %v337_v20  ;;  %v318_v36 = vld [vmem:[#allocation5 + $0x80] sm:$0xff]  ;;  %v317_v37 = vld [vmem:[#allocation5 + $0x78] sm:$0xff]  ;;  %v315_v39 = vld [vmem:[#allocation5 + $0x68] sm:$0xff]  ;;  %p860_p12 = pneg %p859_p8  ;;  %p865_p0 = scmp.lt.s32.totalorder %s863_s7, %s857_s2 }
  0x56   : > { %377 = vmatprep.subr.mxu0 %v333_v21  ;;  %680 = vmatprep.subr.mxu1 %v963_v4  ;;  %v314_v40 = vld [vmem:[#allocation5 + $0x60] sm:$0xff]  ;;  %v316_v41 = vld [vmem:[#allocation5 + $0x70] sm:$0xff]  ;;  %v311_v43 = vld [vmem:[#allocation5 + $0x48] sm:$0xff] }
  0x57   : > { %378 = vmatpush1.msra.mxu0 %v332_v22  ;;  %681 = vmatpush3.msra.mxu1 %v334_v23  ;;  %v312_v42 = vld [vmem:[#allocation5 + $0x50] sm:$0xff]  ;;  %v313_v44 = vld [vmem:[#allocation5 + $0x58] sm:$0xff]  ;;  %v310_v47 = vld [vmem:[#allocation5 + $0x40] sm:$0xff]  ;;  %p866_p3 = por %p865_p0, %p864_p2 }
  0x58   : > { %379 = vmatprep.subr.mxu0 %v330_v24  ;;  %682 = vmatprep.subr.mxu1 %v963_v4  ;;  %v309_v45 = vld [vmem:[#allocation5 + $0x38] sm:$0xff]  ;;  %v308_v46 = vld [vmem:[#allocation5 + $0x30] sm:$0xff]  ;;  %v306_v48 = vld [vmem:[#allocation5 + $0x20] sm:$0xff] }
  0x59   : > { %380 = vmatpush1.msra.mxu0 %v329_v25  ;;  %683 = vmatpush3.msra.mxu1 %v331_v26  ;;  %v305_v49 = vld [vmem:[#allocation5 + $0x18] sm:$0xff]  ;;  %v307_v50 = vld [vmem:[#allocation5 + $0x28] sm:$0xff]  ;;  %v302_v52 = vld [vmem:[#allocation5] sm:$0xff]  ;;  %p867_p5 = pnand %p866_p3, %p860_p12 }
  0x5a   : > { %381 = vmatprep.subr.mxu0 %v327_v27  ;;  %684 = vmatprep.subr.mxu1 %v963_v4  ;;  %v303_v51 = vld [vmem:[#allocation5 + $0x8] sm:$0xff]  ;;  %v304_v53 = vld [vmem:[#allocation5 + $0x10] sm:$0xff] }
  0x5b   : > { %382 = vmatpush1.msra.mxu0 %v326_v28  ;;  %685 = vmatpush3.msra.mxu1 %v328_v29  ;;  %v648_v58 = vld [vmem:[%s1221_s3] ss:$0 sm:$0xff] }
  0x5c   : > { %383 = vmatprep.subr.mxu0 %v324_v30  ;;  %686 = vmatprep.subr.mxu1 %v963_v4  ;;  %v649_v60 = vld [vmem:[%s1222_s4] ss:$0 sm:$0xff] }
  0x5d   : > { %384 = vmatpush1.msra.mxu0 %v323_v31  ;;  %687 = vmatpush3.msra.mxu1 %v325_v32  ;;  %v350_v3 = vld [vmem:[%s1248_s14] sm:$0x7] }
  0x5e   : > { %385 = vmatprep.subr.mxu0 %v321_v33  ;;  %688 = vmatprep.subr.mxu1 %v963_v4 }
  0x5f   : > { %386 = vmatpush1.msra.mxu0 %v320_v34  ;;  %689 = vmatpush3.msra.mxu1 %v322_v35 }
  0x60   : > { %387 = vmatprep.subr.mxu0 %v318_v36  ;;  %690 = vmatprep.subr.mxu1 %v963_v4 }
  0x61   : > { %388 = vmatpush1.msra.mxu0 %v317_v37  ;;  %691 = vmatpush3.msra.mxu1 %v319_v38 }
  0x62   : > { %389 = vmatprep.subr.mxu0 %v315_v39  ;;  %692 = vmatprep.subr.mxu1 %v963_v4 }
  0x63   : > { %390 = vmatpush1.msra.mxu0 %v314_v40  ;;  %693 = vmatpush3.msra.mxu1 %v316_v41 }
  0x64   : > { %391 = vmatprep.subr.mxu0 %v312_v42  ;;  %694 = vmatprep.subr.mxu1 %v963_v4 }
  0x65   : > { %392 = vmatpush1.msra.mxu0 %v311_v43  ;;  %695 = vmatpush3.msra.mxu1 %v313_v44 }
  0x66   : > { %393 = vmatprep.subr.mxu0 %v309_v45  ;;  %696 = vmatprep.subr.mxu1 %v963_v4 }
  0x67   : > { %394 = vmatpush1.msra.mxu0 %v308_v46  ;;  %697 = vmatpush3.msra.mxu1 %v310_v47 }
  0x68   : > { %395 = vmatprep.subr.mxu0 %v306_v48  ;;  %698 = vmatprep.subr.mxu1 %v963_v4 }
  0x69   : > { %396 = vmatpush1.msra.mxu0 %v305_v49  ;;  %699 = vmatpush3.msra.mxu1 %v307_v50 }
  0x6a   : > { %397 = vmatprep.subr.mxu0 %v303_v51  ;;  %700 = vmatprep.subr.mxu1 %v963_v4 }
  0x6b   : > { %398 = vmatpush1.msra.mxu0 %v302_v52  ;;  %701 = vmatpush3.msra.mxu1 %v304_v53 }
  0x6c   : > { %702 = vmatprep.mubr.msk.f32.mxu1 %vm964_vm0, %v963_v4 }
  0xd4   : > { %v277_v14 = vpop.xlane.xlu0 %276 }
  0xd5   : > { %v279_v15 = vmul.f32 0.0078125, %v277_v14 }
  0xd7   : > { %v1139_v16 = vsub.f32 %v273_v0, %v279_v15  ;;  %v353_v0 = vshrl.u32 %v352_v63, 7 }
  0xd9   : > { %v281_v17 = vmul.f32 %v1139_v16, %v1139_v16  ;;  %v354_v1 = vsub.s32 0, %v353_v0  ;;  %v362_v2 = vsub.s32 2, %v353_v0  ;;  %v358_v4 = vsub.s32 1, %v353_v0 }
  0xdb   : > { %282 = vadd.xlane.f32.xlu0 %v281_v17  ;;  %v355_v5 = vrot.slane %v350_v3, %v354_v1  ;;  %v363_v6 = vrot.slane %v350_v3, %v362_v2  ;;  %v359_v7 = vrot.slane %v350_v3, %v358_v4 }
 0x164   : > { %v283_v54 = vpop.xlane.xlu0 %282 }
 0x165   : > { %v284_v55 = vmul.f32 0.0078125, %v283_v54 }
 0x167   : > { %v285_v56 = vadd.f32 1e-05, %v284_v55 }
 0x169   : > { %801 = vrsqrt.f32 %v285_v56 }
 0x176   : > { %v802_v57 = vpop.eup %801 }
 0x177   : > { %v287_v59 = vmul.f32 %v802_v57, %v1139_v16 }
 0x179   : > { %v294_v61 = vmul.f32 %v648_v58, %v287_v59 }
 0x17b   : > { %v301_v62 = vadd.f32 %v649_v60, %v294_v61 }
 0x17d   : > { %432 = vmatmul.mubr.f32.vlgmr.msra.gmra.mxu0 %v301_v62  ;;  %703 = vmatmul.mubr.f32.vlgmr.msra.gmra.mxu1 %v301_v62 }
 0x23d   : > { %v433_v8 = vpop.f32.mrf.mxu0  ;;  %v504_v9 = vpop.f32.mrf.mxu1 }
 0x23e   : > { %v434_v10 = vadd.f32 %v433_v8, %v355_v5  ;;  %v505_v11 = vadd.f32 %v504_v9, %v363_v6 }
 0x23f   : > { %v435_v12 = vpop.f32.mrf.mxu0  ;;  %v704_v13 = vpop.f32.mrf.mxu1 }
 0x240   : > { %v515_v14 = vmul.f32 0.17677669, %v434_v10  ;;  %523 = vst [vmem:[%s272_s17 + $0x10] sm:$0xff] %v505_v11  ;;  %v436_v15 = vadd.f32 %v435_v12, %v359_v7 }
 0x242   : > { %521 = vst [vmem:[%s272_s17] sm:$0xff] %v515_v14  ;;  %522 = vst [vmem:[%s272_s17 + $0x8] sm:$0xff] %v436_v15 }
 0x243   : > { %870 = shalt.err (!%p867_p5)
}
 0x244   : > { %s871_s27 = scalar_lea.hbm %s1171_s8, 384  ;;  %s875_s13 = scalar_lea.hbm %s1251_s6, 1536 }
 0x245   : > { %p872_p4 = scmp.ne.s32.totalorder %s1171_s8, %s871_s27  ;;  %p876_p9 = scmp.lt.s32.totalorder %s1171_s8, %s1251_s6 }
 0x246   : > { %p877_p13 = scmp.lt.s32.totalorder %s875_s13, %s871_s27 }
 0x247   : > { %p873_p6 = pnand %p872_p4, %p1084_p11 }
 0x248   : > { %p878_p10 = por %p877_p13, %p876_p9 }
 0x249   : > { %p874_p7 = pneg %p873_p6 }
 0x24b   : > { %p879_p1 = pnand %p878_p10, %p874_p7 }
 0x24d   : > { %882 = shalt.err (!%p879_p1)
}
 0x24e   : > { %714 = dma.vmem_to_hbm [thread:$0]  (%p1084_p11), %s542_s12, 384, %s1171_s8, %s525_s1  }
 0x24f PF: > { %s1252_s26 = sld [smem:[#allocation11_spill]]  ;;  %p731_p8 = scmp.ge.s32.totalorder %s957_s25, 2 }
 0x250   : > { %s1253_s10 = sld [smem:[#allocation12_spill]] }
 0x255   : > { %s553_s17 = sand.u32 1, %s1252_s26  }
 0x256   : > { %p1254_p12 = scmp.ne.s32.totalorder %s1253_s10, 0  ;;  %s554_s21 = scalar_lea.sflag [#allocation4], %s553_s17 }
 0x258   : > { %p725_p2 = pnand %p731_p8, %p1254_p12 }
 0x25a   : > { %p726_p0 = pneg %p725_p2 }
 0x25c   : > { %924 = dma.done.wait (%p726_p0), %s554_s21, 384  }
 0x25d   : > { %926 = vsyncadd (%p726_p0), %s554_s21, 4294966912  ;;  %s22_s25 = sadd.s32 1, %s957_s25   ;;  %s1255_s11 = sld [smem:[#allocation13_spill]] }
 0x25e   : > { %p19_p3 = scmp.ge.s32.totalorder %s22_s25, 6   ;;  %s1256_s18 = smov %s933_s19 }
 0x25f   : > { %s1257_s19 = smov %s937_s20  ;;  %s1258_s20 = smov %s1101_s15 }
 0x260   : > { %s1259_s21 = smov %s949_s23  ;;  %s1260_s22 = smov %s953_s24 }
 0x261   : > { %s1262_s24 = smov %s1268_s16  ;;  %21 = sbr.rel (!%p19_p3) target bundleno = 12 (0xc), region = 89 }
 0x263   : > { %s1261_s23 = smov %s1255_s11 }
 0x266   :  { %559 = vsyncpa [#allocation3], 1 }
 0x267   :  { %561 = vsyncpa [#allocation3 + $0x1], 1 }
 0x268   :  { %562 = vsyncpa [#allocation6], 1 }
 0x269   :  { %563 = vsyncpa [#allocation4], 1 }
 0x26a   :  { %565 = vsyncpa [#allocation4 + $0x1], 1 }

</bundles_post_ra>
